<compile_context>
chip_gen: v6e
topology: v6e:2x2x1
jax: 0.10.0
libtpu: 0.0.40
codegen_flags: <defaults>
</compile_context>

<pallas_src>
import jax
import jax.numpy as jnp
from jax.experimental import pallas as pl
from jax.experimental.pallas import tpu as pltpu


def _stage2_kernel(alpha_ref, x_ref, w1_ref, w2_ref, o_ref):
    # alpha_ref: SMEM scalar-prefetch (1,)
    # x_ref : (tile_r, pack*in_dim)   `pack` original rows folded into one 128-lane row
    # w1_ref: (pack*in_dim, pack*32)  block-diagonal replication of w1.T (VMEM-resident)
    # w2_ref: (pack*32, pack)         block-diagonal replication of w2.T (VMEM-resident)
    # o_ref : (tile_r, pack)
    a = alpha_ref[0]

    # Linear 1 on the MXU: dense (tile_r,128)x(128,256) -> (tile_r,256), f32 accumulate.
    h = jnp.dot(x_ref[...], w1_ref[...], preferred_element_type=jnp.float32)

    # PReLU (single shared parameter, PyTorch default num_parameters=1), lane-dense slab.
    h = jnp.where(h > 0, h, a * h)

    # Dropout: eval-mode identity.
    # TODO(synk): training-mode dropout (PRNG mask + 1/(1-p) scaling) not implemented.

    # Linear 2 via block-diagonal w2 replication: (tile_r,256)x(256,8) -> (tile_r,8).
    o_ref[...] = jnp.dot(h, w2_ref[...], preferred_element_type=jnp.float32)


def stage2_forward(x, w1, w2, alpha, *, block_rows=32768):
    """Stage2Model forward.

    x: (B, in_dim) f32; w1: (32, in_dim); w2: (1, 32); alpha: scalar PReLU slope.
    Returns (B, 1) f32.
    """
    B, in_dim = x.shape
    hidden, _ = w1.shape
    out_f = w2.shape[0]

    # Lane-packing factor: fold `pack` consecutive batch rows into one 128-lane row.
    pack = 128 // in_dim if (in_dim <= 128 and 128 % in_dim == 0) else 1

    # Pad B only up to pack-1 rows (cheap) so the packed reshape is valid.
    pad = (-B) % pack
    xp = jnp.pad(x, ((0, pad), (0, 0))) if pad else x
    Bp = B + pad
    R = Bp // pack
    x_packed = xp.reshape(R, pack * in_dim)            # free row-major view when pad == 0

    # Block-diagonal weight replications (built once, tiny).
    eye = jnp.eye(pack, dtype=jnp.float32)
    w1_bd = jnp.kron(eye, w1.T.astype(jnp.float32)).astype(x.dtype)  # (pack*in_dim, pack*hidden)
    w2_bd = jnp.kron(eye, w2.T.astype(jnp.float32))                  # (pack*hidden, pack*out_f)

    alpha_arr = jnp.asarray(alpha, jnp.float32).reshape((1,))

    # Tile selection: multiple of 8 packed rows, ~block_rows original rows (~2 MiB of x)
    # per grid step; for non-tiny batches force >= 2 grid steps so both TCs get work.
    tile_target = max(8, block_rows // pack)
    if R <= 8:
        tile_r = R
    else:
        half = -(-R // 2)                      # cdiv(R, 2)
        half = ((half + 7) // 8) * 8           # round up to sublane multiple
        tile_r = max(8, (min(tile_target, half) // 8) * 8)
    grid_r = pl.cdiv(R, tile_r)                # partial last block is masked by Pallas

    out_packed = pl.pallas_call(
        _stage2_kernel,
        out_shape=jax.ShapeDtypeStruct((R, pack * out_f), jnp.float32),
        grid_spec=pltpu.PrefetchScalarGridSpec(
            num_scalar_prefetch=1,             # alpha -> SMEM
            grid=(grid_r,),
            in_specs=[
                pl.BlockSpec((tile_r, pack * in_dim), lambda i, a: (i, 0)),  # x: batch-tiled
                pl.BlockSpec(w1_bd.shape, lambda i, a: (0, 0)),              # weights: resident
                pl.BlockSpec(w2_bd.shape, lambda i, a: (0, 0)),
            ],
            out_specs=pl.BlockSpec((tile_r, pack * out_f), lambda i, a: (i, 0)),
        ),
        compiler_params=pltpu.CompilerParams(
            dimension_semantics=("parallel",),         # shard batch grid across TCs
            vmem_limit_bytes=48 * 1024 * 1024,
        ),
    )(alpha_arr, x_packed, w1_bd, w2_bd)

    out = out_packed.reshape(Bp, out_f)                # unpack: free row-major view
    return out[:B] if Bp != B else out


def _reference(x, w1, w2, alpha):
    h = x @ w1.T
    h = jnp.where(h > 0, h, alpha * h)
    return h @ w2.T


if __name__ == "__main__":
    key = jax.random.PRNGKey(0)
    in_dim, hidden = 16, 32
    kx1, kx2, kx3, k1, k2 = jax.random.split(key, 5)

    # nn.Linear default init ~ U(-1/sqrt(fan_in), 1/sqrt(fan_in)); deterministic init suffices.
    w1 = jax.random.uniform(k1, (hidden, in_dim), jnp.float32,
                            minval=-1.0 / in_dim ** 0.5, maxval=1.0 / in_dim ** 0.5)
    w2 = jax.random.uniform(k2, (1, hidden), jnp.float32,
                            minval=-1.0 / hidden ** 0.5, maxval=1.0 / hidden ** 0.5)
    alpha = 0.25  # PReLU default init

    # Case 1: small batch, single tile (whole packed batch in one block).
    B1 = 8
    x1 = jax.random.normal(kx1, (B1, in_dim), dtype=jnp.float32)
    o1 = jax.block_until_ready(stage2_forward(x1, w1, w2, alpha))
    assert o1.shape == (B1, 1)
    assert jnp.allclose(o1, _reference(x1, w1, w2, alpha), atol=2e-5, rtol=2e-5)

    # Case 2: batch not a multiple of the packing factor (exercises the small pad path).
    B2 = 21
    x2 = jax.random.normal(kx2, (B2, in_dim), dtype=jnp.float32)
    o2 = jax.block_until_ready(stage2_forward(x2, w1, w2, alpha))
    assert o2.shape == (B2, 1)
    assert jnp.allclose(o2, _reference(x2, w1, w2, alpha), atol=2e-5, rtol=2e-5)

    # Case 3: multi-step batch grid with a partial (masked) last block.
    B3 = 1000
    x3 = jax.random.normal(kx3, (B3, in_dim), dtype=jnp.float32)
    o3 = jax.block_until_ready(stage2_forward(x3, w1, w2, alpha, block_rows=256))
    assert o3.shape == (B3, 1)
    assert jnp.allclose(o3, _reference(x3, w1, w2, alpha), atol=2e-5, rtol=2e-5)

    print("KERNEL_OK")
</pallas_src>

<mosaic_0001>
module attributes {stable_mosaic.version = 11 : i64} {
  func.func @_stage2_kernel(%arg0: i32, %arg1: memref<1xf32, #tpu.memory_space<smem>>, %arg2: memref<1x128xf32, #tpu.memory_space<vmem>>, %arg3: memref<128x256xf32, #tpu.memory_space<vmem>>, %arg4: memref<256x8xf32, #tpu.memory_space<vmem>>, %arg5: memref<1x8xf32, #tpu.memory_space<vmem>>) attributes {dimension_semantics = [#tpu.dimension_semantics<parallel>], iteration_bounds = array<i64: 1>, scalar_prefetch = 1 : i64, scratch_operands = 0 : i64, tpu.core_type = #tpu.core_type<tc>, window_params = [{transform_indices = @transform_0, window_bounds = array<i64: 1, 128>}, {pipeline_mode = #tpu.pipeline_mode<synchronous>, transform_indices = @transform_1, window_bounds = array<i64: 128, 256>}, {pipeline_mode = #tpu.pipeline_mode<synchronous>, transform_indices = @transform_2, window_bounds = array<i64: 256, 8>}, {transform_indices = @transform_3, window_bounds = array<i64: 1, 8>}]} {
    %c0 = arith.constant 0 : index
    %0 = memref.load %arg1[%c0] : memref<1xf32, #tpu.memory_space<smem>>
    %c0_0 = arith.constant 0 : index
    %c0_1 = arith.constant 0 : index
    %1 = vector.load %arg2[%c0_0, %c0_1] : memref<1x128xf32, #tpu.memory_space<vmem>>, vector<1x128xf32>
    %c0_2 = arith.constant 0 : index
    %c0_3 = arith.constant 0 : index
    %2 = vector.load %arg3[%c0_2, %c0_3] : memref<128x256xf32, #tpu.memory_space<vmem>>, vector<128x256xf32>
    %cst = arith.constant dense<0.000000e+00> : vector<1x256xf32>
    %3 = tpu.matmul %1, %2, %cst {dimension_numbers = #tpu.dot_dimension_numbers<[1], [0], [0], [1], [0, 0, 1, 1], [], []>} : vector<1x128xf32>, vector<128x256xf32>, vector<1x256xf32> -> vector<1x256xf32>
    %cst_4 = arith.constant 0.000000e+00 : f32
    %4 = vector.broadcast %cst_4 : f32 to vector<1x256xf32>
    %5 = arith.cmpf ogt, %3, %4 : vector<1x256xf32>
    %6 = vector.broadcast %0 : f32 to vector<1x256xf32>
    %7 = arith.mulf %6, %3 : vector<1x256xf32>
    %8 = arith.select %5, %3, %7 : vector<1x256xi1>, vector<1x256xf32>
    %c0_5 = arith.constant 0 : index
    %c0_6 = arith.constant 0 : index
    %9 = vector.load %arg4[%c0_5, %c0_6] : memref<256x8xf32, #tpu.memory_space<vmem>>, vector<256x8xf32>
    %cst_7 = arith.constant dense<0.000000e+00> : vector<1x8xf32>
    %10 = tpu.matmul %8, %9, %cst_7 {dimension_numbers = #tpu.dot_dimension_numbers<[1], [0], [0], [1], [0, 0, 1, 1], [], []>} : vector<1x256xf32>, vector<256x8xf32>, vector<1x8xf32> -> vector<1x8xf32>
    %c0_8 = arith.constant 0 : index
    %c0_9 = arith.constant 0 : index
    %11 = vector.load %arg5[%c0_8, %c0_9] : memref<1x8xf32, #tpu.memory_space<vmem>>, vector<1x8xf32>
    tpu.vector_store %arg5[%c0_8, %c0_9], %10 {strides = array<i32>} : memref<1x8xf32, #tpu.memory_space<vmem>>, vector<1x8xf32>,
    return
  }
  func.func @transform_0(%arg0: i32, %arg1: memref<1xf32, #tpu.memory_space<smem>>) -> (i32, i32) {
    %c0_i32 = arith.constant 0 : i32
    %c0_i32_0 = arith.constant 0 : i32
    return %arg0, %c0_i32 : i32, i32
  }
  func.func @transform_1(%arg0: i32, %arg1: memref<1xf32, #tpu.memory_space<smem>>) -> (i32, i32) {
    %c0_i32 = arith.constant 0 : i32
    %c0_i32_0 = arith.constant 0 : i32
    %c0_i32_1 = arith.constant 0 : i32
    return %c0_i32, %c0_i32_0 : i32, i32
  }
  func.func @transform_2(%arg0: i32, %arg1: memref<1xf32, #tpu.memory_space<smem>>) -> (i32, i32) {
    %c0_i32 = arith.constant 0 : i32
    %c0_i32_0 = arith.constant 0 : i32
    %c0_i32_1 = arith.constant 0 : i32
    return %c0_i32, %c0_i32_0 : i32, i32
  }
  func.func @transform_3(%arg0: i32, %arg1: memref<1xf32, #tpu.memory_space<smem>>) -> (i32, i32) {
    %c0_i32 = arith.constant 0 : i32
    %c0_i32_0 = arith.constant 0 : i32
    return %arg0, %c0_i32 : i32, i32
  }
}

</mosaic_0001>

<bundles_post_ra>
// kernel: tpu_custom_call.1
= control target key start
LH: loop header
LB: loop body
LE: loop exit
PB: predicated region body
PF: predicated region fallthrough
CT: control target
= control target key end

     0   :  { %v306_v4 = vmov 0.0   ;;  %s534_s0 = inlined_call_operand.<no memory space> [shape: f32[1], index: 0, kind: input, shape index: {}]   ;;  %s535_s1 = inlined_call_operand.vmem [shape: f32[1,128], index: 1, kind: input, shape index: {}]   ;;  %s536_s2 = inlined_call_operand.vmem [shape: f32[128,256], index: 2, kind: input, shape index: {}]   ;;  %s537_s3 = inlined_call_operand.vmem [shape: f32[256,8], index: 3, kind: input, shape index: {}]   ;;  %s538_s4 = inlined_call_operand.hbm [shape: f32[1,8], index: 4, kind: output, shape index: {}]  }
   0x1   :  { %v50_v0 = vld [vmem:[%s536_s2 + $0xf8] sm:$0xff]  ;;  %v49_v1 = vld [vmem:[%s536_s2 + $0xf0] sm:$0xff]  ;;  %v48_v2 = vld [vmem:[%s536_s2 + $0xe8] sm:$0xff]  ;;  %115 = vmatprep.mubr.f32.mxu0 %v306_v4 }
   0x2   :  { %51 = vmatprep.subr.mxu0 %v50_v0  ;;  %v47_v3 = vld [vmem:[%s536_s2 + $0xe0] sm:$0xff]  ;;  %v46_v5 = vld [vmem:[%s536_s2 + $0xd8] sm:$0xff]  ;;  %v45_v6 = vld [vmem:[%s536_s2 + $0xd0] sm:$0xff] }
   0x3   :  { %52 = vmatpush1.msra.mxu0 %v49_v1  ;;  %v44_v7 = vld [vmem:[%s536_s2 + $0xc8] sm:$0xff]  ;;  %v43_v8 = vld [vmem:[%s536_s2 + $0xc0] sm:$0xff]  ;;  %v42_v9 = vld [vmem:[%s536_s2 + $0xb8] sm:$0xff] }
   0x4   :  { %53 = vmatprep.subr.mxu0 %v48_v2  ;;  %v41_v10 = vld [vmem:[%s536_s2 + $0xb0] sm:$0xff]  ;;  %v40_v11 = vld [vmem:[%s536_s2 + $0xa8] sm:$0xff]  ;;  %v39_v12 = vld [vmem:[%s536_s2 + $0xa0] sm:$0xff] }
   0x5   :  { %54 = vmatpush1.msra.mxu0 %v47_v3  ;;  %v38_v13 = vld [vmem:[%s536_s2 + $0x98] sm:$0xff]  ;;  %v37_v14 = vld [vmem:[%s536_s2 + $0x90] sm:$0xff]  ;;  %v36_v18 = vld [vmem:[%s536_s2 + $0x88] sm:$0xff] }
   0x6   :  { %55 = vmatprep.subr.mxu0 %v46_v5  ;;  %v160_v15 = vld [vmem:[%s537_s3 + $0xf8] sm:$0xff]  ;;  %v159_v17 = vld [vmem:[%s537_s3 + $0xf0] sm:$0xff]  ;;  %v35_v20 = vld [vmem:[%s536_s2 + $0x80] sm:$0xff] }
   0x7   :  { %56 = vmatpush1.msra.mxu0 %v45_v6  ;;  %v144_v16 = vld [vmem:[%s537_s3 + $0x78] sm:$0xff]  ;;  %247 = vmatprep.subr.mxu1 %v160_v15  ;;  %v143_v19 = vld [vmem:[%s537_s3 + $0x70] sm:$0xff]  ;;  %v158_v21 = vld [vmem:[%s537_s3 + $0xe8] sm:$0xff] }
   0x8   :  { %57 = vmatprep.subr.mxu0 %v44_v7  ;;  %248 = vmatpush3.msra.mxu1 %v144_v16  ;;  %v34_v22 = vld [vmem:[%s536_s2 + $0x78] sm:$0xff]  ;;  %v142_v23 = vld [vmem:[%s537_s3 + $0x68] sm:$0xff]  ;;  %v33_v24 = vld [vmem:[%s536_s2 + $0x70] sm:$0xff] }
   0x9   :  { %58 = vmatpush1.msra.mxu0 %v43_v8  ;;  %249 = vmatprep.subr.mxu1 %v159_v17  ;;  %v157_v25 = vld [vmem:[%s537_s3 + $0xe0] sm:$0xff]  ;;  %v32_v26 = vld [vmem:[%s536_s2 + $0x68] sm:$0xff]  ;;  %v156_v29 = vld [vmem:[%s537_s3 + $0xd8] sm:$0xff] }
   0xa   :  { %59 = vmatprep.subr.mxu0 %v42_v9  ;;  %250 = vmatpush3.msra.mxu1 %v143_v19  ;;  %v141_v27 = vld [vmem:[%s537_s3 + $0x60] sm:$0xff]  ;;  %v30_v30 = vld [vmem:[%s536_s2 + $0x58] sm:$0xff]  ;;  %v29_v32 = vld [vmem:[%s536_s2 + $0x50] sm:$0xff] }
   0xb   :  { %60 = vmatpush1.msra.mxu0 %v41_v10  ;;  %251 = vmatprep.subr.mxu1 %v158_v21  ;;  %v31_v28 = vld [vmem:[%s536_s2 + $0x60] sm:$0xff]  ;;  %v140_v31 = vld [vmem:[%s537_s3 + $0x58] sm:$0xff]  ;;  %v155_v33 = vld [vmem:[%s537_s3 + $0xd0] sm:$0xff] }
   0xc   :  { %61 = vmatprep.subr.mxu0 %v40_v11  ;;  %252 = vmatpush3.msra.mxu1 %v142_v23 }
   0xd   :  { %62 = vmatpush1.msra.mxu0 %v39_v12  ;;  %253 = vmatprep.subr.mxu1 %v157_v25 }
   0xe   :  { %63 = vmatprep.subr.mxu0 %v38_v13  ;;  %254 = vmatpush3.msra.mxu1 %v141_v27 }
   0xf   :  { %64 = vmatpush1.msra.mxu0 %v37_v14 }
  0x10   :  { %65 = vmatprep.subr.mxu0 %v36_v18 }
  0x11   :  { %66 = vmatpush1.msra.mxu0 %v35_v20 }
  0x12   :  { %67 = vmatprep.subr.mxu0 %v34_v22 }
  0x13   :  { %68 = vmatpush1.msra.mxu0 %v33_v24 }
  0x14   :  { %69 = vmatprep.subr.mxu0 %v32_v26 }
  0x15   :  { %10 = vsyncpa [#allocation5], 0  ;;  %70 = vmatpush1.msra.mxu0 %v31_v28  ;;  %v28_v34 = vld [vmem:[%s536_s2 + $0x48] sm:$0xff]  ;;  %255 = vmatprep.subr.mxu1 %v156_v29  ;;  %v139_v35 = vld [vmem:[%s537_s3 + $0x50] sm:$0xff]  ;;  %v124_v2 = vstv %s534_s0  ;;  %s307_s15 = smov [#allocation4]   ;;  %vm231_vm2 = vcmask 57344  }
  0x16   :  { %71 = vmatprep.subr.mxu0 %v30_v30  ;;  %v27_v36 = vld [vmem:[%s536_s2 + $0x40] sm:$0xff]  ;;  %256 = vmatpush3.msra.mxu1 %v140_v31  ;;  %v154_v37 = vld [vmem:[%s537_s3 + $0xc8] sm:$0xff]  ;;  %v26_v38 = vld [vmem:[%s536_s2 + $0x38] sm:$0xff] }
  0x17   :  { %72 = vmatpush1.msra.mxu0 %v29_v32  ;;  %257 = vmatprep.subr.mxu1 %v155_v33  ;;  %v138_v39 = vld [vmem:[%s537_s3 + $0x48] sm:$0xff]  ;;  %v25_v40 = vld [vmem:[%s536_s2 + $0x30] sm:$0xff]  ;;  %v153_v41 = vld [vmem:[%s537_s3 + $0xc0] sm:$0xff] }
  0x18   :  { %73 = vmatprep.subr.mxu0 %v28_v34  ;;  %258 = vmatpush3.msra.mxu1 %v139_v35  ;;  %v24_v42 = vld [vmem:[%s536_s2 + $0x28] sm:$0xff]  ;;  %v137_v43 = vld [vmem:[%s537_s3 + $0x40] sm:$0xff]  ;;  %v152_v45 = vld [vmem:[%s537_s3 + $0xb8] sm:$0xff] }
  0x19   :  { %74 = vmatpush1.msra.mxu0 %v27_v36  ;;  %259 = vmatprep.subr.mxu1 %v154_v37  ;;  %v23_v44 = vld [vmem:[%s536_s2 + $0x20] sm:$0xff]  ;;  %v22_v46 = vld [vmem:[%s536_s2 + $0x18] sm:$0xff]  ;;  %v21_v48 = vld [vmem:[%s536_s2 + $0x10] sm:$0xff] }
  0x1a   :  { %75 = vmatprep.subr.mxu0 %v26_v38  ;;  %260 = vmatpush3.msra.mxu1 %v138_v39  ;;  %v136_v47 = vld [vmem:[%s537_s3 + $0x38] sm:$0xff]  ;;  %v151_v49 = vld [vmem:[%s537_s3 + $0xb0] sm:$0xff]  ;;  %v20_v50 = vld [vmem:[%s536_s2 + $0x8] sm:$0xff] }
  0x1b   :  { %76 = vmatpush1.msra.mxu0 %v25_v40  ;;  %261 = vmatprep.subr.mxu1 %v153_v41  ;;  %v135_v51 = vld [vmem:[%s537_s3 + $0x30] sm:$0xff]  ;;  %v19_v52 = vld [vmem:[%s536_s2] sm:$0xff]  ;;  %v150_v53 = vld [vmem:[%s537_s3 + $0xa8] sm:$0xff] }
  0x1c   :  { %77 = vmatprep.subr.mxu0 %v24_v42  ;;  %262 = vmatpush3.msra.mxu1 %v137_v43  ;;  %v18_v54 = vld [vmem:[%s535_s1] sm:$0x1]  ;;  %v134_v55 = vld [vmem:[%s537_s3 + $0x28] sm:$0xff]  ;;  %v148_v58 = vld [vmem:[%s537_s3 + $0x98] sm:$0xff] }
  0x1d   :  { %78 = vmatpush1.msra.mxu0 %v23_v44  ;;  %263 = vmatprep.subr.mxu1 %v152_v45  ;;  %v149_v56 = vld [vmem:[%s537_s3 + $0xa0] sm:$0xff]  ;;  %v132_v59 = vld [vmem:[%s537_s3 + $0x18] sm:$0xff]  ;;  %v147_v60 = vld [vmem:[%s537_s3 + $0x90] sm:$0xff] }
  0x1e   :  { %79 = vmatprep.subr.mxu0 %v22_v46  ;;  %264 = vmatpush3.msra.mxu1 %v136_v47  ;;  %v133_v57 = vld [vmem:[%s537_s3 + $0x20] sm:$0xff]  ;;  %v131_v61 = vld [vmem:[%s537_s3 + $0x10] sm:$0xff]  ;;  %v146_v62 = vld [vmem:[%s537_s3 + $0x88] sm:$0xff] }
  0x1f   :  { %80 = vmatpush1.msra.mxu0 %v21_v48  ;;  %265 = vmatprep.subr.mxu1 %v151_v49  ;;  %v130_v63 = vld [vmem:[%s537_s3 + $0x8] sm:$0xff]  ;;  %v145_v0 = vld [vmem:[%s537_s3 + $0x80] sm:$0xff] }
  0x20   :  { %81 = vmatprep.subr.mxu0 %v20_v50  ;;  %266 = vmatpush3.msra.mxu1 %v135_v51  ;;  %v129_v1 = vld [vmem:[%s537_s3] sm:$0xff]  ;;  %s239_s3 = sshll.u32 %s307_s15, 4  ;;  %s240_s3 = int_to_ptr.vmem [resolvable:$true] %s239_s3 }
  0x21   :  { %82 = vmatpush1.msra.mxu0 %v19_v52  ;;  %267 = vmatprep.subr.mxu1 %v150_v53  ;;  %s284_s16 = scalar_lea.vmem %s240_s3, 16  ;;  %s288_s0 = scalar_lea.vmem %s240_s3, 32 }
  0x22   :  { %116 = vmatmul.mubr.f32.vlgmr.msra.gmra.mxu0 %v18_v54  ;;  %268 = vmatpush3.msra.mxu1 %v134_v55  ;;  %p285_p0 = scmp.ne.s32.totalorder %s240_s3, %s284_s16  ;;  %p289_p1 = scmp.lt.s32.totalorder %s240_s3, %s240_s3 }
  0x23   :  { %269 = vmatprep.subr.mxu1 %v149_v56  ;;  %p290_p2 = scmp.lt.s32.totalorder %s288_s0, %s284_s16 }
  0x24   :  { %270 = vmatpush3.msra.mxu1 %v133_v57 }
  0x25   :  { %271 = vmatprep.subr.mxu1 %v148_v58  ;;  %p291_p3 = por %p290_p2, %p289_p1 }
  0x26   :  { %272 = vmatpush3.msra.mxu1 %v132_v59 }
  0x27   :  { %273 = vmatprep.subr.mxu1 %v147_v60  ;;  %p292_p4 = pnand %p291_p3, %p285_p0 }
  0x28   :  { %274 = vmatpush3.msra.mxu1 %v131_v61 }
  0x29   :  { %275 = vmatprep.subr.mxu1 %v146_v62 }
  0x2a   :  { %276 = vmatpush3.msra.mxu1 %v130_v63 }
  0x2b   :  { %277 = vmatprep.subr.mxu1 %v145_v0 }
  0x2c   :  { %278 = vmatpush3.msra.mxu1 %v129_v1 }
  0xe2   :  { %v117_v3 = vpop.f32.mrf.mxu0 }
  0xe3   :  { %v125_v5 = vmul.f32 %v124_v2, %v117_v3  ;;  %vm122_vm0 = vcmp.gt.f32.partialorder %v117_v3, 0.0 }
  0xe4   :  { %v119_v4 = vpop.f32.mrf.mxu0 }
  0xe5   :  { %vm123_vm1 = vcmp.gt.f32.partialorder %v119_v4, 0.0  ;;  %v126_v6 = vmul.f32 %v124_v2, %v119_v4  ;;  %v127_v8 = vsel %vm122_vm0, %v117_v3, %v125_v5 }
  0xe7   :  { %v128_v7 = vsel %vm123_vm1, %v119_v4, %v126_v6 }
  0xe8   :  { %225 = vmatprep.mubr.f32.mxu1 %v128_v7 }
  0xe9   :  { %226 = vmatmul.mubr.f32.vlgmr.msra.gmra.mxu1 %v127_v8 }
 0x1a9   :  { %v279_v9 = vpop.f32.mrf.mxu1 }
 0x1ab   :  { %v280_v10 = vpop.f32.mrf.mxu1 }
 0x1ac   :  { %v281_v11 = vadd.f32 %v280_v10, %v279_v9 }
 0x1ae   :  { %232 = vst.msk [vmem:[#allocation4] sm:$0x1] %vm231_vm2, %v281_v11 }
 0x1af   :  { %295 = shalt.err (!%p292_p4)
}
 0x1b0   :  { %242 = dma.vmem_to_hbm [thread:$0]  %s240_s3, 16, %s538_s4, [#allocation5]  }
 0x1b1   :  { %304 = dma.done.wait [#allocation5], 16  }
 0x1b2   :  { %305 = vsyncadd [#allocation5], 4294967280 }
 0x1b3   :  { %246 = vsyncpa [#allocation5], 1 }

</bundles_post_ra>
